<compile_context>
chip_gen: v5e
topology: v5e:2x2
jax: 0.10.0
libtpu: 0.0.40
codegen_flags: <defaults>
</compile_context>

<pallas_src>
import functools

import jax
import jax.numpy as jnp
from jax import lax
from jax.experimental import pallas as pl
from jax.experimental.pallas import tpu as pltpu

_LANE = 128
_HALF_LOG_2PI = 0.9189385332046727  # 0.5 * log(2*pi)


def _digamma_lgamma_asym(x):
    """For x > 0: shift to x >= 4, return (digamma(x), lgamma_asym, den)
    where the true lgamma(x) = lgamma_asym - log(den).  The log(den) is left
    to the caller so it can be fused with the other lgamma's correction."""
    num = jnp.zeros_like(x)
    den = jnp.ones_like(x)
    for _ in range(4):                       # unrolled; pure VALU cmp/mul/add/sel
        small = x < 4.0
        num = jnp.where(small, num * x + den, num)   # running sum of 1/x as num/den
        den = jnp.where(small, den * x, den)         # running product of skipped x
        x = jnp.where(small, x + 1.0, x)
    logx = jnp.log(x)
    inv = pl.reciprocal(x, approx=True)
    inv2 = inv * inv
    # digamma(x) ~ log x - 1/(2x) - 1/(12x^2) + 1/(120x^4) - 1/(252x^6)
    dig = (logx - 0.5 * inv
           - inv2 * (1.0 / 12.0 - inv2 * (1.0 / 120.0 - inv2 * (1.0 / 252.0))))
    dig = dig - num * pl.reciprocal(den, approx=True)
    # lgamma(x) ~ (x-0.5)log x - x + 0.5 log(2pi) + 1/(12x) - 1/(360x^3) + 1/(1260x^5)
    lg = ((x - 0.5) * logx - x + _HALF_LOG_2PI
          + inv * (1.0 / 12.0 - inv2 * (1.0 / 360.0 - inv2 * (1.0 / 1260.0))))
    return dig, lg, den


def _lgamma_asym(x):
    """For x > 0: shift to x >= 4, return (lgamma_asym, den); lgamma = lg - log(den)."""
    den = jnp.ones_like(x)
    for _ in range(4):
        small = x < 4.0
        den = jnp.where(small, den * x, den)
        x = jnp.where(small, x + 1.0, x)
    logx = jnp.log(x)
    inv = pl.reciprocal(x, approx=True)
    inv2 = inv * inv
    lg = ((x - 0.5) * logx - x + _HALF_LOG_2PI
          + inv * (1.0 / 12.0 - inv2 * (1.0 / 360.0 - inv2 * (1.0 / 1260.0))))
    return lg, den


def _kl_gamma_kernel(q_ref, p_ref, o_ref,
                     *, n, tile_rows, min_mu, min_theta, padded):
    c = pl.program_id(0)          # "parallel" core axis (only >1 on 2-TC chips)
    j = pl.program_id(1)          # "arbitrary" reduction axis
    steps = pl.num_programs(1)

    @pl.when(j == 0)
    def _():
        o_ref[...] = jnp.zeros_like(o_ref)

    # q_ref/p_ref blocks are (2, tile_rows, 128): [0]=mu stream, [1]=theta stream.
    mu_q = jnp.maximum(q_ref[0], min_mu)
    theta_q = jnp.maximum(q_ref[1], min_theta)
    mu_p = jnp.maximum(p_ref[0], min_mu)
    theta_p = jnp.maximum(p_ref[1], min_theta)

    inv_tq = pl.reciprocal(theta_q, approx=True)
    inv_tp = pl.reciprocal(theta_p, approx=True)
    kappa_q = mu_q * inv_tq
    kappa_p = mu_p * inv_tp

    dig_q, lg_q_asym, den_q = _digamma_lgamma_asym(kappa_q)
    lg_p_asym, den_p = _lgamma_asym(kappa_p)

    # lgamma(kappa_p) - lgamma(kappa_q), with the two shift corrections fused
    # into a single log: (lgA_p - log den_p) - (lgA_q - log den_q)
    lg_diff = lg_p_asym - lg_q_asym + jnp.log(den_q * pl.reciprocal(den_p, approx=True))

    # Algebraically simplified KL(Gamma_q || Gamma_p); theta_q*kappa_q == mu_q.
    batch_loss = ((kappa_q - kappa_p) * dig_q
                  + kappa_p * jnp.log(theta_p * inv_tq)
                  - kappa_q + lg_diff
                  + mu_q * inv_tp)

    log_loss = jnp.log(jnp.maximum(batch_loss, 1e-30))

    if padded:
        # Static Python flag: compiled out when N fills the padded layout.
        # Per-block scalar limit vs. a hoisted in-block iota (cmp + select / elem).
        block = c * steps + j
        limit = n - block * (tile_rows * _LANE)          # int32 scalar
        rows = lax.broadcasted_iota(jnp.int32, log_loss.shape, 0)
        lanes = lax.broadcasted_iota(jnp.int32, log_loss.shape, 1)
        idx = rows * _LANE + lanes                        # in-block index (constant)
        log_loss = jnp.where(idx < limit, log_loss, 0.0)

    # Elementwise (VALU-only) partial reduction into a resident (8,128) tile;
    # the tiny final cross-lane reduce happens once in the wrapper.
    partial = log_loss.reshape(tile_rows // 8, 8, _LANE).sum(axis=0)
    o_ref[...] += partial


def _tensorcores_per_chip():
    """2 on v7x (megacore split via 'parallel' grid axis), else 1."""
    try:
        kind = jax.devices()[0].device_kind.lower()
    except Exception:
        return 1
    return 2 if "7" in kind else 1


def kl_gamma_loss(outputs, labels, min_mu=1e-10, min_theta=1e-10,
                  max_tile_rows=2048):
    """outputs, labels: (N, 2); returns mean(log(clamp(KL(Gamma_q||Gamma_p), 1e-30)))."""
    outputs = jnp.asarray(outputs, jnp.float32)
    labels = jnp.asarray(labels, jnp.float32)
    n = int(outputs.shape[0])
    if n == 0:
        raise ValueError("KLGammaLoss requires at least one row (mean over N).")

    max_tile_rows = max(8, (int(max_tile_rows) // 8) * 8)
    rows_needed = -(-n // _LANE)
    tile_rows = min(max_tile_rows, -(-rows_needed // 8) * 8)
    # Only split across TensorCores on chips that actually have 2 (v7x);
    # on v5e/v6e a 2-wide split would just add fully-padded wasted compute.
    num_cores = 2 if (_tensorcores_per_chip() == 2 and rows_needed > tile_rows) else 1
    total_rows = -(-rows_needed // (tile_rows * num_cores)) * tile_rows * num_cores
    steps = total_rows // (tile_rows * num_cores)
    n_pad = total_rows * _LANE
    padded = n_pad != n

    def prep(x2):
        # (N, 2) -> (2, total_rows, 128): ONE fused pad + transpose per tensor
        # (benign 1.0 padding; padded tail is masked in-kernel).
        x2 = jnp.pad(x2, ((0, n_pad - n), (0, 0)), constant_values=1.0)
        return x2.T.reshape(2, total_rows, _LANE)

    q_stack = prep(outputs)   # [mu_q; theta_q]
    p_stack = prep(labels)    # [mu_p; theta_p]

    kernel = functools.partial(
        _kl_gamma_kernel, n=n, tile_rows=tile_rows,
        min_mu=float(min_mu), min_theta=float(min_theta), padded=padded)

    in_spec = pl.BlockSpec((2, tile_rows, _LANE), lambda c, j: (0, c * steps + j, 0))
    partials = pl.pallas_call(
        kernel,
        out_shape=jax.ShapeDtypeStruct((8 * num_cores, _LANE), jnp.float32),
        grid=(num_cores, steps),
        in_specs=[in_spec, in_spec],
        out_specs=pl.BlockSpec((8, _LANE), lambda c, j: (c, 0)),
        compiler_params=pltpu.CompilerParams(
            dimension_semantics=("parallel", "arbitrary")),
        cost_estimate=pl.CostEstimate(
            flops=120 * n_pad,
            transcendentals=11 * n_pad,
            bytes_accessed=4 * 4 * n_pad + 4 * 8 * num_cores * _LANE),
    )(q_stack, p_stack)

    # Final tiny reduction + static 1/N (denominator known at trace time).
    return jnp.sum(partials) * (1.0 / n)


# ---------------------------------------------------------------------------
# Plain-JAX reference for a sanity check
# ---------------------------------------------------------------------------

def kl_gamma_loss_ref(outputs, labels, min_mu=1e-10, min_theta=1e-10):
    from jax.scipy.special import digamma, gammaln
    mu_q = jnp.maximum(outputs[:, 0], min_mu)
    theta_q = jnp.maximum(outputs[:, 1], min_theta)
    mu_p = jnp.maximum(labels[:, 0], min_mu)
    theta_p = jnp.maximum(labels[:, 1], min_theta)
    kappa_q = mu_q / theta_q
    kappa_p = mu_p / theta_p
    batch_loss = (
        (kappa_q - 1) * digamma(kappa_q) - jnp.log(theta_q) - kappa_q
        - gammaln(kappa_q) + gammaln(kappa_p) + kappa_p * jnp.log(theta_p)
        - (kappa_p - 1) * (digamma(kappa_q) + jnp.log(theta_q))
        + theta_q * kappa_q / theta_p
    )
    return jnp.mean(jnp.log(jnp.maximum(batch_loss, 1e-30)))


if __name__ == "__main__":
    key = jax.random.PRNGKey(0)

    # (N, max_tile_rows): single-tile case, padded case, and a multi-tile /
    # masked-tail case (forced via a tiny tile).
    for n, mtr in ((8, 2048), (300, 2048), (3000, 8)):
        k1, k2, key = jax.random.split(key, 3)
        outputs = jax.random.uniform(k1, (n, 2), jnp.float32, minval=0.5, maxval=1.5)
        labels = jax.random.uniform(k2, (n, 2), jnp.float32, minval=2.0, maxval=4.0)

        got = jax.block_until_ready(kl_gamma_loss(outputs, labels, max_tile_rows=mtr))
        ref = jax.block_until_ready(kl_gamma_loss_ref(outputs, labels))

        assert bool(jnp.isfinite(got)), f"non-finite result for n={n}"
        assert bool(jnp.allclose(got, ref, rtol=2e-2, atol=2e-2)), (n, float(got), float(ref))

    print("KERNEL_OK")
</pallas_src>

<mosaic_0001>
module attributes {stable_mosaic.version = 11 : i64} {
  func.func @_kl_gamma_kernel(%arg0: i32, %arg1: i32, %arg2: memref<2x8x128xf32, #tpu.memory_space<vmem>>, %arg3: memref<2x8x128xf32, #tpu.memory_space<vmem>>, %arg4: memref<8x128xf32, #tpu.memory_space<vmem>>) attributes {dimension_semantics = [#tpu.dimension_semantics<parallel>, #tpu.dimension_semantics<arbitrary>], iteration_bounds = array<i64: 1, 1>, scalar_prefetch = 0 : i64, scratch_operands = 0 : i64, tpu.core_type = #tpu.core_type<tc>, window_params = [{transform_indices = @transform_0, window_bounds = array<i64: 2, 8, 128>}, {transform_indices = @transform_1, window_bounds = array<i64: 2, 8, 128>}, {transform_indices = @transform_2, window_bounds = array<i64: 8, 128>}]} {
    %c0_i32 = arith.constant 0 : i32
    %0 = arith.cmpi eq, %arg1, %c0_i32 : i32
    %1 = arith.extui %0 : i1 to i32
    %c0_i32_0 = arith.constant 0 : i32
    %2 = arith.cmpi ne, %1, %c0_i32_0 : i32
    scf.if %2 {
      %cst_54 = arith.constant 0.000000e+00 : f32
      %181 = vector.broadcast %cst_54 : f32 to vector<8x128xf32>
      %c0_55 = arith.constant 0 : index
      %c0_56 = arith.constant 0 : index
      %182 = vector.load %arg4[%c0_55, %c0_56] : memref<8x128xf32, #tpu.memory_space<vmem>>, vector<8x128xf32>
      tpu.vector_store %arg4[%c0_55, %c0_56], %181 {strides = array<i32>} : memref<8x128xf32, #tpu.memory_space<vmem>>, vector<8x128xf32>,
    } else {
    }
    %c0 = arith.constant 0 : index
    %c0_1 = arith.constant 0 : index
    %c0_2 = arith.constant 0 : index
    %3 = vector.load %arg2[%c0, %c0_1, %c0_2] : memref<2x8x128xf32, #tpu.memory_space<vmem>>, vector<1x8x128xf32>
    %4 = vector.shape_cast %3 : vector<1x8x128xf32> to vector<8x128xf32>
    %cst = arith.constant 1.000000e-10 : f32
    %5 = vector.broadcast %cst : f32 to vector<8x128xf32>
    %6 = arith.maximumf %4, %5 : vector<8x128xf32>
    %c1 = arith.constant 1 : index
    %c0_3 = arith.constant 0 : index
    %c0_4 = arith.constant 0 : index
    %7 = vector.load %arg2[%c1, %c0_3, %c0_4] : memref<2x8x128xf32, #tpu.memory_space<vmem>>, vector<1x8x128xf32>
    %8 = vector.shape_cast %7 : vector<1x8x128xf32> to vector<8x128xf32>
    %cst_5 = arith.constant 1.000000e-10 : f32
    %9 = vector.broadcast %cst_5 : f32 to vector<8x128xf32>
    %10 = arith.maximumf %8, %9 : vector<8x128xf32>
    %c0_6 = arith.constant 0 : index
    %c0_7 = arith.constant 0 : index
    %c0_8 = arith.constant 0 : index
    %11 = vector.load %arg3[%c0_6, %c0_7, %c0_8] : memref<2x8x128xf32, #tpu.memory_space<vmem>>, vector<1x8x128xf32>
    %12 = vector.shape_cast %11 : vector<1x8x128xf32> to vector<8x128xf32>
    %cst_9 = arith.constant 1.000000e-10 : f32
    %13 = vector.broadcast %cst_9 : f32 to vector<8x128xf32>
    %14 = arith.maximumf %12, %13 : vector<8x128xf32>
    %c1_10 = arith.constant 1 : index
    %c0_11 = arith.constant 0 : index
    %c0_12 = arith.constant 0 : index
    %15 = vector.load %arg3[%c1_10, %c0_11, %c0_12] : memref<2x8x128xf32, #tpu.memory_space<vmem>>, vector<1x8x128xf32>
    %16 = vector.shape_cast %15 : vector<1x8x128xf32> to vector<8x128xf32>
    %cst_13 = arith.constant 1.000000e-10 : f32
    %17 = vector.broadcast %cst_13 : f32 to vector<8x128xf32>
    %18 = arith.maximumf %16, %17 : vector<8x128xf32>
    %19 = tpu.reciprocal %10 {approx = true} : vector<8x128xf32> -> vector<8x128xf32>
    %20 = tpu.reciprocal %18 {approx = true} : vector<8x128xf32> -> vector<8x128xf32>
    %21 = arith.mulf %6, %19 : vector<8x128xf32>
    %22 = arith.mulf %14, %20 : vector<8x128xf32>
    %cst_14 = arith.constant 0.000000e+00 : f32
    %23 = vector.broadcast %cst_14 : f32 to vector<8x128xf32>
    %cst_15 = arith.constant 1.000000e+00 : f32
    %24 = vector.broadcast %cst_15 : f32 to vector<8x128xf32>
    %cst_16 = arith.constant 4.000000e+00 : f32
    %25 = vector.broadcast %cst_16 : f32 to vector<8x128xf32>
    %26 = arith.cmpf olt, %21, %25 : vector<8x128xf32>
    %27 = arith.mulf %23, %21 : vector<8x128xf32>
    %28 = arith.addf %27, %24 : vector<8x128xf32>
    %29 = arith.select %26, %28, %23 : vector<8x128xi1>, vector<8x128xf32>
    %30 = arith.mulf %24, %21 : vector<8x128xf32>
    %31 = arith.select %26, %30, %24 : vector<8x128xi1>, vector<8x128xf32>
    %cst_17 = arith.constant 1.000000e+00 : f32
    %32 = vector.broadcast %cst_17 : f32 to vector<8x128xf32>
    %33 = arith.addf %21, %32 : vector<8x128xf32>
    %34 = arith.select %26, %33, %21 : vector<8x128xi1>, vector<8x128xf32>
    %cst_18 = arith.constant 4.000000e+00 : f32
    %35 = vector.broadcast %cst_18 : f32 to vector<8x128xf32>
    %36 = arith.cmpf olt, %34, %35 : vector<8x128xf32>
    %37 = arith.mulf %29, %34 : vector<8x128xf32>
    %38 = arith.addf %37, %31 : vector<8x128xf32>
    %39 = arith.select %36, %38, %29 : vector<8x128xi1>, vector<8x128xf32>
    %40 = arith.mulf %31, %34 : vector<8x128xf32>
    %41 = arith.select %36, %40, %31 : vector<8x128xi1>, vector<8x128xf32>
    %cst_19 = arith.constant 1.000000e+00 : f32
    %42 = vector.broadcast %cst_19 : f32 to vector<8x128xf32>
    %43 = arith.addf %34, %42 : vector<8x128xf32>
    %44 = arith.select %36, %43, %34 : vector<8x128xi1>, vector<8x128xf32>
    %cst_20 = arith.constant 4.000000e+00 : f32
    %45 = vector.broadcast %cst_20 : f32 to vector<8x128xf32>
    %46 = arith.cmpf olt, %44, %45 : vector<8x128xf32>
    %47 = arith.mulf %39, %44 : vector<8x128xf32>
    %48 = arith.addf %47, %41 : vector<8x128xf32>
    %49 = arith.select %46, %48, %39 : vector<8x128xi1>, vector<8x128xf32>
    %50 = arith.mulf %41, %44 : vector<8x128xf32>
    %51 = arith.select %46, %50, %41 : vector<8x128xi1>, vector<8x128xf32>
    %cst_21 = arith.constant 1.000000e+00 : f32
    %52 = vector.broadcast %cst_21 : f32 to vector<8x128xf32>
    %53 = arith.addf %44, %52 : vector<8x128xf32>
    %54 = arith.select %46, %53, %44 : vector<8x128xi1>, vector<8x128xf32>
    %cst_22 = arith.constant 4.000000e+00 : f32
    %55 = vector.broadcast %cst_22 : f32 to vector<8x128xf32>
    %56 = arith.cmpf olt, %54, %55 : vector<8x128xf32>
    %57 = arith.mulf %49, %54 : vector<8x128xf32>
    %58 = arith.addf %57, %51 : vector<8x128xf32>
    %59 = arith.select %56, %58, %49 : vector<8x128xi1>, vector<8x128xf32>
    %60 = arith.mulf %51, %54 : vector<8x128xf32>
    %61 = arith.select %56, %60, %51 : vector<8x128xi1>, vector<8x128xf32>
    %cst_23 = arith.constant 1.000000e+00 : f32
    %62 = vector.broadcast %cst_23 : f32 to vector<8x128xf32>
    %63 = arith.addf %54, %62 : vector<8x128xf32>
    %64 = arith.select %56, %63, %54 : vector<8x128xi1>, vector<8x128xf32>
    %65 = math.log %64 : vector<8x128xf32>
    %66 = tpu.reciprocal %64 {approx = true} : vector<8x128xf32> -> vector<8x128xf32>
    %67 = arith.mulf %66, %66 : vector<8x128xf32>
    %cst_24 = arith.constant 5.000000e-01 : f32
    %68 = vector.broadcast %cst_24 : f32 to vector<8x128xf32>
    %69 = arith.mulf %68, %66 : vector<8x128xf32>
    %70 = arith.subf %65, %69 : vector<8x128xf32>
    %cst_25 = arith.constant 0.0039682542 : f32
    %71 = vector.broadcast %cst_25 : f32 to vector<8x128xf32>
    %72 = arith.mulf %67, %71 : vector<8x128xf32>
    %cst_26 = arith.constant 0.00833333377 : f32
    %73 = vector.broadcast %cst_26 : f32 to vector<8x128xf32>
    %74 = arith.subf %73, %72 : vector<8x128xf32>
    %75 = arith.mulf %67, %74 : vector<8x128xf32>
    %cst_27 = arith.constant 0.0833333358 : f32
    %76 = vector.broadcast %cst_27 : f32 to vector<8x128xf32>
    %77 = arith.subf %76, %75 : vector<8x128xf32>
    %78 = arith.mulf %67, %77 : vector<8x128xf32>
    %79 = arith.subf %70, %78 : vector<8x128xf32>
    %80 = tpu.reciprocal %61 {approx = true} : vector<8x128xf32> -> vector<8x128xf32>
    %81 = arith.mulf %59, %80 : vector<8x128xf32>
    %82 = arith.subf %79, %81 : vector<8x128xf32>
    %cst_28 = arith.constant 5.000000e-01 : f32
    %83 = vector.broadcast %cst_28 : f32 to vector<8x128xf32>
    %84 = arith.subf %64, %83 : vector<8x128xf32>
    %85 = arith.mulf %84, %65 : vector<8x128xf32>
    %86 = arith.subf %85, %64 : vector<8x128xf32>
    %cst_29 = arith.constant 0.918938517 : f32
    %87 = vector.broadcast %cst_29 : f32 to vector<8x128xf32>
    %88 = arith.addf %86, %87 : vector<8x128xf32>
    %cst_30 = arith.constant 7.93650805E-4 : f32
    %89 = vector.broadcast %cst_30 : f32 to vector<8x128xf32>
    %90 = arith.mulf %67, %89 : vector<8x128xf32>
    %cst_31 = arith.constant 0.00277777785 : f32
    %91 = vector.broadcast %cst_31 : f32 to vector<8x128xf32>
    %92 = arith.subf %91, %90 : vector<8x128xf32>
    %93 = arith.mulf %67, %92 : vector<8x128xf32>
    %cst_32 = arith.constant 0.0833333358 : f32
    %94 = vector.broadcast %cst_32 : f32 to vector<8x128xf32>
    %95 = arith.subf %94, %93 : vector<8x128xf32>
    %96 = arith.mulf %66, %95 : vector<8x128xf32>
    %97 = arith.addf %88, %96 : vector<8x128xf32>
    %cst_33 = arith.constant 1.000000e+00 : f32
    %98 = vector.broadcast %cst_33 : f32 to vector<8x128xf32>
    %cst_34 = arith.constant 4.000000e+00 : f32
    %99 = vector.broadcast %cst_34 : f32 to vector<8x128xf32>
    %100 = arith.cmpf olt, %22, %99 : vector<8x128xf32>
    %101 = arith.mulf %98, %22 : vector<8x128xf32>
    %102 = arith.select %100, %101, %98 : vector<8x128xi1>, vector<8x128xf32>
    %cst_35 = arith.constant 1.000000e+00 : f32
    %103 = vector.broadcast %cst_35 : f32 to vector<8x128xf32>
    %104 = arith.addf %22, %103 : vector<8x128xf32>
    %105 = arith.select %100, %104, %22 : vector<8x128xi1>, vector<8x128xf32>
    %cst_36 = arith.constant 4.000000e+00 : f32
    %106 = vector.broadcast %cst_36 : f32 to vector<8x128xf32>
    %107 = arith.cmpf olt, %105, %106 : vector<8x128xf32>
    %108 = arith.mulf %102, %105 : vector<8x128xf32>
    %109 = arith.select %107, %108, %102 : vector<8x128xi1>, vector<8x128xf32>
    %cst_37 = arith.constant 1.000000e+00 : f32
    %110 = vector.broadcast %cst_37 : f32 to vector<8x128xf32>
    %111 = arith.addf %105, %110 : vector<8x128xf32>
    %112 = arith.select %107, %111, %105 : vector<8x128xi1>, vector<8x128xf32>
    %cst_38 = arith.constant 4.000000e+00 : f32
    %113 = vector.broadcast %cst_38 : f32 to vector<8x128xf32>
    %114 = arith.cmpf olt, %112, %113 : vector<8x128xf32>
    %115 = arith.mulf %109, %112 : vector<8x128xf32>
    %116 = arith.select %114, %115, %109 : vector<8x128xi1>, vector<8x128xf32>
    %cst_39 = arith.constant 1.000000e+00 : f32
    %117 = vector.broadcast %cst_39 : f32 to vector<8x128xf32>
    %118 = arith.addf %112, %117 : vector<8x128xf32>
    %119 = arith.select %114, %118, %112 : vector<8x128xi1>, vector<8x128xf32>
    %cst_40 = arith.constant 4.000000e+00 : f32
    %120 = vector.broadcast %cst_40 : f32 to vector<8x128xf32>
    %121 = arith.cmpf olt, %119, %120 : vector<8x128xf32>
    %122 = arith.mulf %116, %119 : vector<8x128xf32>
    %123 = arith.select %121, %122, %116 : vector<8x128xi1>, vector<8x128xf32>
    %cst_41 = arith.constant 1.000000e+00 : f32
    %124 = vector.broadcast %cst_41 : f32 to vector<8x128xf32>
    %125 = arith.addf %119, %124 : vector<8x128xf32>
    %126 = arith.select %121, %125, %119 : vector<8x128xi1>, vector<8x128xf32>
    %127 = math.log %126 : vector<8x128xf32>
    %128 = tpu.reciprocal %126 {approx = true} : vector<8x128xf32> -> vector<8x128xf32>
    %129 = arith.mulf %128, %128 : vector<8x128xf32>
    %cst_42 = arith.constant 5.000000e-01 : f32
    %130 = vector.broadcast %cst_42 : f32 to vector<8x128xf32>
    %131 = arith.subf %126, %130 : vector<8x128xf32>
    %132 = arith.mulf %131, %127 : vector<8x128xf32>
    %133 = arith.subf %132, %126 : vector<8x128xf32>
    %cst_43 = arith.constant 0.918938517 : f32
    %134 = vector.broadcast %cst_43 : f32 to vector<8x128xf32>
    %135 = arith.addf %133, %134 : vector<8x128xf32>
    %cst_44 = arith.constant 7.93650805E-4 : f32
    %136 = vector.broadcast %cst_44 : f32 to vector<8x128xf32>
    %137 = arith.mulf %129, %136 : vector<8x128xf32>
    %cst_45 = arith.constant 0.00277777785 : f32
    %138 = vector.broadcast %cst_45 : f32 to vector<8x128xf32>
    %139 = arith.subf %138, %137 : vector<8x128xf32>
    %140 = arith.mulf %129, %139 : vector<8x128xf32>
    %cst_46 = arith.constant 0.0833333358 : f32
    %141 = vector.broadcast %cst_46 : f32 to vector<8x128xf32>
    %142 = arith.subf %141, %140 : vector<8x128xf32>
    %143 = arith.mulf %128, %142 : vector<8x128xf32>
    %144 = arith.addf %135, %143 : vector<8x128xf32>
    %145 = arith.subf %144, %97 : vector<8x128xf32>
    %146 = tpu.reciprocal %123 {approx = true} : vector<8x128xf32> -> vector<8x128xf32>
    %147 = arith.mulf %61, %146 : vector<8x128xf32>
    %148 = math.log %147 : vector<8x128xf32>
    %149 = arith.addf %145, %148 : vector<8x128xf32>
    %150 = arith.subf %21, %22 : vector<8x128xf32>
    %151 = arith.mulf %150, %82 : vector<8x128xf32>
    %152 = arith.mulf %18, %19 : vector<8x128xf32>
    %153 = math.log %152 : vector<8x128xf32>
    %154 = arith.mulf %22, %153 : vector<8x128xf32>
    %155 = arith.addf %151, %154 : vector<8x128xf32>
    %156 = arith.subf %155, %21 : vector<8x128xf32>
    %157 = arith.addf %156, %149 : vector<8x128xf32>
    %158 = arith.mulf %6, %20 : vector<8x128xf32>
    %159 = arith.addf %157, %158 : vector<8x128xf32>
    %cst_47 = arith.constant 1.000000e-30 : f32
    %160 = vector.broadcast %cst_47 : f32 to vector<8x128xf32>
    %161 = arith.maximumf %159, %160 : vector<8x128xf32>
    %162 = math.log %161 : vector<8x128xf32>
    %c1_i32 = arith.constant 1 : i32
    %163 = arith.muli %arg0, %c1_i32 : i32
    %164 = arith.addi %163, %arg1 : i32
    %c1024_i32 = arith.constant 1024 : i32
    %165 = arith.muli %164, %c1024_i32 : i32
    %c8_i32 = arith.constant 8 : i32
    %166 = arith.subi %c8_i32, %165 : i32
    %167 = tpu.iota {dimensions = array<i32: 0>} : vector<8x128xi32>
    %168 = tpu.iota {dimensions = array<i32: 1>} : vector<8x128xi32>
    %c128_i32 = arith.constant 128 : i32
    %169 = vector.broadcast %c128_i32 : i32 to vector<8x128xi32>
    %170 = arith.muli %167, %169 : vector<8x128xi32>
    %171 = arith.addi %170, %168 : vector<8x128xi32>
    %172 = vector.broadcast %166 : i32 to vector<8x128xi32>
    %173 = arith.cmpi slt, %171, %172 : vector<8x128xi32>
    %cst_48 = arith.constant 0.000000e+00 : f32
    %174 = vector.broadcast %cst_48 : f32 to vector<8x128xf32>
    %175 = arith.select %173, %162, %174 : vector<8x128xi1>, vector<8x128xf32>
    %176 = vector.shape_cast %175 : vector<8x128xf32> to vector<1x8x128xf32>
    %cst_49 = arith.constant dense<0.000000e+00> : vector<8x128xf32>
    %177 = vector.multi_reduction <add>, %176, %cst_49 [0] : vector<1x8x128xf32> to vector<8x128xf32>
    %c0_50 = arith.constant 0 : index
    %c0_51 = arith.constant 0 : index
    %178 = vector.load %arg4[%c0_50, %c0_51] : memref<8x128xf32, #tpu.memory_space<vmem>>, vector<8x128xf32>
    %179 = arith.addf %178, %177 : vector<8x128xf32>
    %c0_52 = arith.constant 0 : index
    %c0_53 = arith.constant 0 : index
    %180 = vector.load %arg4[%c0_52, %c0_53] : memref<8x128xf32, #tpu.memory_space<vmem>>, vector<8x128xf32>
    tpu.vector_store %arg4[%c0_52, %c0_53], %179 {strides = array<i32>} : memref<8x128xf32, #tpu.memory_space<vmem>>, vector<8x128xf32>,
    return
  }
  func.func @transform_0(%arg0: i32, %arg1: i32) -> (i32, i32, i32) {
    %c1_i32 = arith.constant 1 : i32
    %0 = arith.muli %arg0, %c1_i32 : i32
    %1 = arith.addi %0, %arg1 : i32
    %c0_i32 = arith.constant 0 : i32
    %c0_i32_0 = arith.constant 0 : i32
    %c0_i32_1 = arith.constant 0 : i32
    return %c0_i32, %1, %c0_i32_0 : i32, i32, i32
  }
  func.func @transform_1(%arg0: i32, %arg1: i32) -> (i32, i32, i32) {
    %c1_i32 = arith.constant 1 : i32
    %0 = arith.muli %arg0, %c1_i32 : i32
    %1 = arith.addi %0, %arg1 : i32
    %c0_i32 = arith.constant 0 : i32
    %c0_i32_0 = arith.constant 0 : i32
    %c0_i32_1 = arith.constant 0 : i32
    return %c0_i32, %1, %c0_i32_0 : i32, i32, i32
  }
  func.func @transform_2(%arg0: i32, %arg1: i32) -> (i32, i32) {
    %c0_i32 = arith.constant 0 : i32
    %c0_i32_0 = arith.constant 0 : i32
    return %arg0, %c0_i32 : i32, i32
  }
}

</mosaic_0001>

<bundles_post_ra>
// kernel: tpu_custom_call.1
= control target key start
LH: loop header
LB: loop body
LE: loop exit
PB: predicated region body
PF: predicated region fallthrough
CT: control target
= control target key end

     0   :  { %7 = vsyncpa [#allocation3], 0  ;;  %s388_s0 = inlined_call_operand.hbm [shape: f32[2,8,128], index: 0, kind: input, shape index: {}]   ;;  %s389_s1 = inlined_call_operand.hbm [shape: f32[2,8,128], index: 1, kind: input, shape index: {}]   ;;  %s390_s2 = inlined_call_operand.hbm [shape: f32[8,128], index: 2, kind: output, shape index: {}]  }
   0x1   :  { %8 = vsyncpa [#allocation6], 0 }
   0x2   :  { %9 = vsyncpa [#allocation4], 0  ;;  %s17_s11 = sshll.u32 %s388_s0, 4  ;;  %s322_s12 = smov [#allocation2]   ;;  %s18_s11 = int_to_ptr.hbm [resolvable:$true] %s17_s11 }
   0x3   :  { %s19_s13 = sshll.u32 %s322_s12, 4  ;;  %s33_s16 = sshll.u32 %s389_s1, 4  ;;  %s20_s13 = int_to_ptr.vmem [resolvable:$true] %s19_s13  ;;  %s34_s16 = int_to_ptr.hbm [resolvable:$true] %s33_s16 }
   0x4   :  { %s323_s17 = smov 128   ;;  %s324_s18 = smov 8  }
   0x5   :  { %25 = dma.hbm_to_vmem [thread:$0]  %s18_s11, 256, %s20_s13, [#allocation3], %s323_s17, %s323_s17, %s324_s18  }
   0x6   :  { %s325_s19 = smov [#allocation5]  }
   0x7   :  { %s35_s20 = sshll.u32 %s325_s19, 4  ;;  %s36_s20 = int_to_ptr.vmem [resolvable:$true] %s35_s20 }
   0x8   :  { %41 = dma.hbm_to_vmem [thread:$0]  %s34_s16, 256, %s36_s20, [#allocation6], %s323_s17, %s323_s17, %s324_s18  }
   0x9   :  { %316 = dma.done.wait [#allocation3], 256  }
   0xa   :  { %317 = vsyncadd [#allocation3], 4294967040 }
   0xb   :  { %318 = dma.done.wait [#allocation6], 256  }
   0xc   :  { %319 = vsyncadd [#allocation6], 4294967040  ;;  %v60_v0 = vld [vmem:[#allocation2 + $0x8] sm:$0xff]  ;;  %v65_v2 = vld [vmem:[#allocation5 + $0x8] sm:$0xff]  ;;  %s326_s0 = smov [#allocation7]   ;;  %s203_s23 = sshll.u32 %s390_s2, 4  ;;  %s204_s23 = int_to_ptr.hbm [resolvable:$true] %s203_s23 }
   0xd   :  { %v61_v1 = vmax.f32 %v60_v0, 1e-10  ;;  %v348_v3 = vld [vmem:[#allocation2] sm:$0xff]  ;;  %v66_v4 = vmax.f32 %v65_v2, 1e-10  ;;  %v62_v5 = vld [vmem:[#allocation5] sm:$0xff] }
   0xe   :  { %v58_v6 = vmax.f32 %v348_v3, 1e-10  ;;  %v63_v7 = vmax.f32 %v62_v5, 1e-10  ;;  %s201_s1 = sshll.u32 %s326_s0, 4  ;;  %s202_s1 = int_to_ptr.vmem [resolvable:$true] %s201_s1 }
   0xf   :  { %222 = vrcp.f32 %v61_v1 }
  0x10   :  { %224 = vrcp.f32 %v66_v4 }
  0x15   :  { %v223_v8 = vpop.eup %222 }
  0x16   :  { %v353_v9 = vmul.f32 %v223_v8, %v58_v6  ;;  %v355_v10 = vpop.eup %224  ;;  %v168_v43 = vmul.f32 %v223_v8, %v66_v4 }
  0x17   :  { %v358_v11 = vmul.f32 %v355_v10, %v63_v7 }
  0x18   :  { %vm71_vm0 = vcmp.lt.f32.partialorder %v353_v9, 4.0  ;;  %v72_v12 = vmul.f32 0.0, %v353_v9  ;;  %v76_v13 = vadd.f32 1.0, %v353_v9 }
  0x19   :  { %v75_v14 = vsel %vm71_vm0, %v353_v9, 1.0  ;;  %vm127_vm1 = vcmp.lt.f32.partialorder %v358_v11, 4.0  ;;  %v129_v17 = vadd.f32 1.0, %v358_v11 }
  0x1a   :  { %v73_v15 = vadd.f32 1.0, %v72_v12  ;;  %v77_v16 = vsel %vm71_vm0, %v76_v13, %v353_v9  ;;  %v128_v20 = vsel %vm127_vm1, %v358_v11, 1.0 }
  0x1b   :  { %vm78_vm2 = vcmp.lt.f32.partialorder %v77_v16, 4.0  ;;  %v82_v18 = vmul.f32 %v77_v16, %v75_v14  ;;  %v84_v19 = vadd.f32 1.0, %v77_v16  ;;  %v130_v22 = vsel %vm127_vm1, %v129_v17, %v358_v11 }
  0x1c   :  { %v74_v21 = vsel %vm71_vm0, %v73_v15, 0.0  ;;  %v132_v27 = vmul.f32 %v130_v22, %v128_v20  ;;  %vm131_vm4 = vcmp.lt.f32.partialorder %v130_v22, 4.0  ;;  %v134_v30 = vadd.f32 1.0, %v130_v22 }
  0x1d   :  { %v79_v23 = vmul.f32 %v77_v16, %v74_v21  ;;  %v83_v24 = vsel %vm78_vm2, %v82_v18, %v75_v14  ;;  %v85_v25 = vsel %vm78_vm2, %v84_v19, %v77_v16 }
  0x1e   :  { %vm86_vm3 = vcmp.lt.f32.partialorder %v85_v25, 4.0  ;;  %v92_v26 = vadd.f32 1.0, %v85_v25  ;;  %v90_v29 = vmul.f32 %v85_v25, %v83_v24  ;;  %v133_v32 = vsel %vm131_vm4, %v132_v27, %v128_v20 }
  0x1f   :  { %v80_v28 = vadd.f32 %v79_v23, %v75_v14  ;;  %v135_v36 = vsel %vm131_vm4, %v134_v30, %v130_v22 }
  0x20   :  { %v93_v31 = vsel %vm86_vm3, %v92_v26, %v85_v25  ;;  %v91_v37 = vsel %vm86_vm3, %v90_v29, %v83_v24  ;;  %vm136_vm6 = vcmp.lt.f32.partialorder %v135_v36, 4.0  ;;  %v137_v39 = vmul.f32 %v135_v36, %v133_v32 }
  0x21   :  { %v81_v33 = vsel %vm78_vm2, %v80_v28, %v74_v21  ;;  %vm94_vm5 = vcmp.lt.f32.partialorder %v93_v31, 4.0  ;;  %v100_v34 = vadd.f32 1.0, %v93_v31  ;;  %v139_v41 = vadd.f32 1.0, %v135_v36 }
  0x22   :  { %v87_v35 = vmul.f32 %v85_v25, %v81_v33  ;;  %v138_v42 = vsel %vm136_vm6, %v137_v39, %v133_v32  ;;  %v98_v44 = vmul.f32 %v93_v31, %v91_v37  ;;  %v166_v29 = vsub.f32 %v353_v9, %v358_v11 }
  0x23   :  { %v101_v38 = vsel %vm94_vm5, %v100_v34, %v93_v31  ;;  %v140_v45 = vsel %vm136_vm6, %v139_v41, %v135_v36 }
  0x24   :  { %v88_v40 = vadd.f32 %v87_v35, %v83_v24  ;;  %226 = vlog2.f32 %v101_v38  ;;  %vm141_vm7 = vcmp.lt.f32.partialorder %v140_v45, 4.0  ;;  %v142_v46 = vmul.f32 %v140_v45, %v138_v42 }
  0x25   :  { %228 = vrcp.f32 %v101_v38  ;;  %v144_v47 = vadd.f32 1.0, %v140_v45  ;;  %v99_v52 = vsel %vm94_vm5, %v98_v44, %v91_v37  ;;  %v214_v57 = vadd.f32 -0.5, %v101_v38 }
  0x26   :  { %v89_v48 = vsel %vm86_vm3, %v88_v40, %v81_v33  ;;  %v143_v49 = vsel %vm141_vm7, %v142_v46, %v138_v42  ;;  %230 = vlog2.f32 %v168_v43 }
  0x27   :  { %v145_v50 = vsel %vm141_vm7, %v144_v47, %v140_v45  ;;  %v95_v54 = vmul.f32 %v93_v31, %v89_v48  ;;  %v183_v47 = vlaneseq }
  0x28   :  { %232 = vlog2.f32 %v145_v50  ;;  %v215_v63 = vadd.f32 -0.5, %v145_v50 }
  0x29   :  { %234 = vrcp.f32 %v145_v50  ;;  %v96_v61 = vadd.f32 %v95_v54, %v91_v37 }
  0x2a   :  { %v227_v51 = vpop.eup %226  ;;  %236 = vrcp.f32 %v143_v49  ;;  %v175_v49 = vmul.f32 %v355_v10, %v58_v6 }
  0x2b   :  { %v229_v53 = vpop.eup %228  ;;  %v103_v55 = vmul.f32 0.6931472, %v227_v51  ;;  %238 = vrcp.f32 %v99_v52  ;;  %v97_v16 = vsel %vm94_vm5, %v96_v61, %v89_v48  ;;  %v184_v51 = vshrl.u32 %v183_v47, 7 }
  0x2c   :  { %v105_v56 = vmul.f32 %v229_v53, %v229_v53  ;;  %v231_v60 = vpop.eup %230  ;;  %v106_v62 = vmul.f32 0.5, %v229_v53 }
  0x2d   :  { %v118_v2 = vmul.f32 %v214_v57, %v103_v55  ;;  %v170_v24 = vmul.f32 0.6931472, %v231_v60  ;;  %v187_v54 = vmul.u32 128, %v184_v51 }
  0x2e   :  { %v108_v58 = vmul.f32 0.003968254, %v105_v56  ;;  %v121_v59 = vmul.f32 0.0007936508, %v105_v56  ;;  %v233_v0 = vpop.eup %232  ;;  %v107_v17 = vsub.f32 %v103_v55, %v106_v62 }
  0x2f   :  { %v235_v5 = vpop.eup %234  ;;  %v147_v7 = vmul.f32 0.6931472, %v233_v0  ;;  %v119_v21 = vsub.f32 %v118_v2, %v101_v38  ;;  %v171_v37 = vmul.f32 %v170_v24, %v358_v11 }
  0x30   :  { %v109_v1 = vsub.f32 0.008333334, %v108_v58  ;;  %v122_v4 = vsub.f32 0.0027777778, %v121_v59  ;;  %v237_v8 = vpop.eup %236  ;;  %v149_v14 = vmul.f32 %v235_v5, %v235_v5 }
  0x31   :  { %v239_v15 = vpop.eup %238  ;;  %v151_v18 = vmul.f32 %v215_v63, %v147_v7  ;;  %v162_v19 = vmul.f32 %v237_v8, %v99_v52  ;;  %v120_v32 = vadd.f32 0.9189385, %v119_v21 }
  0x32   :  { %v110_v12 = vmul.f32 %v109_v1, %v105_v56  ;;  %v123_v13 = vmul.f32 %v122_v4, %v105_v56  ;;  %v154_v23 = vmul.f32 0.0007936508, %v149_v14  ;;  %v115_v26 = vmul.f32 %v239_v15, %v97_v16 }
  0x33   :  { %240 = vlog2.f32 %v162_v19  ;;  %v152_v27 = vsub.f32 %v151_v18, %v145_v50 }
  0x34   :  { %v111_v20 = vsub.f32 0.083333336, %v110_v12  ;;  %v124_v22 = vsub.f32 0.083333336, %v123_v13  ;;  %v155_v28 = vsub.f32 0.0027777778, %v154_v23 }
  0x35   :  { %v153_v35 = vadd.f32 0.9189385, %v152_v27 }
  0x36   :  { %v112_v25 = vmul.f32 %v111_v20, %v105_v56  ;;  %v125_v31 = vmul.f32 %v229_v53, %v124_v22  ;;  %v156_v33 = vmul.f32 %v155_v28, %v149_v14  ;;  %v186_v53 = vand.u32 127, %v183_v47 }
  0x38   :  { %v113_v30 = vsub.f32 %v107_v17, %v112_v25  ;;  %v157_v36 = vsub.f32 0.083333336, %v156_v33  ;;  %v126_v39 = vadd.f32 %v125_v31, %v120_v32  ;;  %v188_v55 = vadd.s32 %v187_v54, %v186_v53 }
  0x39   :  { %v241_v38 = vpop.eup %240 }
  0x3a   :  { %v116_v34 = vsub.f32 %v113_v30, %v115_v26  ;;  %v158_v40 = vmul.f32 %v235_v5, %v157_v36  ;;  %v164_v43 = vmul.f32 0.6931472, %v241_v38  ;;  %vm190_vm8 = vcmp.lt.s32.totalorder %v188_v55, 8 }
  0x3c   :  { %v167_v41 = vmul.f32 %v166_v29, %v116_v34  ;;  %v159_v42 = vadd.f32 %v158_v40, %v153_v35 }
  0x3e   :  { %v172_v44 = vadd.f32 %v171_v37, %v167_v41  ;;  %v160_v45 = vsub.f32 %v159_v42, %v126_v39 }
  0x40   :  { %v173_v46 = vsub.f32 %v172_v44, %v353_v9  ;;  %v165_v48 = vadd.f32 %v164_v43, %v160_v45 }
  0x42   :  { %v174_v50 = vadd.f32 %v173_v46, %v165_v48 }
  0x44   :  { %v176_v52 = vadd.f32 %v175_v49, %v174_v50 }
  0x46   :  { %v177_v11 = vmax.f32 %v176_v52, 1e-30 }
  0x48   :  { %242 = vlog2.f32 %v177_v11 }
  0x4e   :  { %v243_v56 = vpop.eup %242 }
  0x4f   :  { %v179_v57 = vmul.f32 0.6931472, %v243_v56 }
  0x51   :  { %v191_v3 = vsel %vm190_vm8, %v179_v57, 0.0 }
  0x52   :  { %195 = vst [vmem:[#allocation7] sm:$0xff] %v191_v3 }
  0x53   :  { %206 = dma.vmem_to_hbm [thread:$0]  %s202_s1, 128, %s204_s23, [#allocation4]  }
  0x54   :  { %320 = dma.done.wait [#allocation4], 128  }
  0x55   :  { %321 = vsyncadd [#allocation4], 4294967168 }
  0x56   :  { %211 = vsyncpa [#allocation3], 1 }
  0x57   :  { %212 = vsyncpa [#allocation6], 1 }
  0x58   :  { %213 = vsyncpa [#allocation4], 1 }

</bundles_post_ra>
